<compile_context>
chip_gen: v7x
topology: tpu7x:2x2x1
jax: 0.10.0
libtpu: 0.0.40
codegen_flags: <defaults>
</compile_context>

<pallas_src>
import jax
import jax.numpy as jnp
from jax.experimental import pallas as pl
from jax.experimental.pallas import tpu as pltpu

POSITIONAL_ENCODING_DIM = 8


def gauss_kernel(tok_ref, mask_ref, w_ref, bias_ref,   # inputs
                 mu_ref, std_ref,                      # outputs
                 acc_ref, cnt_ref):                    # VMEM scratch
    s = pl.program_id(1)

    @pl.when(s == 0)
    def _init():
        acc_ref[...] = jnp.zeros_like(acc_ref)
        cnt_ref[...] = jnp.zeros_like(cnt_ref)

    # --- masked-sum pooling, accumulated across S tiles ---
    tok = tok_ref[...].astype(jnp.float32)        # [tb, ts, H]  (bf16 -> f32)
    mask = mask_ref[...]                          # [tb, ts, 1]  (already float)
    acc_ref[...] += jnp.sum(tok * mask, axis=1)   # [tb, H]
    cnt_ref[...] += jnp.sum(mask, axis=1)         # [tb, 1]

    @pl.when(s == pl.num_programs(1) - 1)
    def _finalize():
        denom = jnp.maximum(cnt_ref[...], 1e-9)                         # [tb, 1]
        pooled = acc_ref[...] * pl.reciprocal(denom, approx=False)      # [tb, H]
        # fused mu/var projection; dates contribution + biases already folded
        # into bias_ref (per-batch [tb, 2H]) outside the kernel.
        proj = (jnp.dot(pooled, w_ref[...],
                        preferred_element_type=jnp.float32)
                + bias_ref[...])                                        # [tb, 2H]
        h = mu_ref.shape[-1]
        mu_ref[...] = jnp.tanh(proj[:, :h])
        # std = sqrt(exp(log_var)) == exp(0.5 * log_var)
        std_ref[...] = jnp.exp(0.5 * proj[:, h:])


def gauss_forward(token_embeddings, attention_mask, dates, params,
                  block_b=None, block_s=None):
    B, S, H = token_embeddings.shape

    # --- wrapper-side layout plumbing (tiny, done once per call) ---
    # Fuse the two projections into one [H, 2H] weight; fold the K=8 dates
    # projection + biases into a per-batch [B, 2H] bias (it does not depend on
    # the pooling, so it never needs to touch the kernel's MXU path).
    w_fused = jnp.concatenate([params["wmu_h"], params["wvar_h"]], axis=1)   # [H, 2H]
    wp_fused = jnp.concatenate([params["wmu_p"], params["wvar_p"]], axis=1)  # [P, 2H]
    b_fused = jnp.concatenate([params["bmu"], params["bvar"]], axis=1)       # [1, 2H]
    date_bias = (dates.astype(jnp.float32) @ wp_fused + b_fused)             # [B, 2H]

    # attention_mask.float().unsqueeze(-1); trailing 1 keeps block shapes legal.
    mask_f = attention_mask.astype(jnp.float32)[:, :, None]                  # [B, S, 1]

    # --- tile selection ---
    if block_b is None:
        block_b = 8 if (B % 8 == 0 and B >= 8) else B
    elif B % block_b != 0:
        block_b = B
    if block_s is None:
        itemsize = jnp.dtype(token_embeddings.dtype).itemsize
        budget = 4 * 1024 * 1024  # per tok block; x2 for double buffering
        block_s = S
        for cand in (2048, 1024, 512, 256, 128, 64, 32, 16, 8):
            if S % cand == 0 and block_b * cand * H * itemsize <= budget:
                block_s = cand
                break
    elif S % block_s != 0:
        block_s = S

    grid = (B // block_b, S // block_s)

    mu, std = pl.pallas_call(
        gauss_kernel,
        out_shape=(jax.ShapeDtypeStruct((B, H), jnp.float32),
                   jax.ShapeDtypeStruct((B, H), jnp.float32)),
        grid_spec=pltpu.PrefetchScalarGridSpec(
            num_scalar_prefetch=0,
            grid=grid,
            in_specs=[
                pl.BlockSpec((block_b, block_s, H), lambda i, k: (i, k, 0)),
                pl.BlockSpec((block_b, block_s, 1), lambda i, k: (i, k, 0)),
                pl.BlockSpec((H, 2 * H), lambda i, k: (0, 0)),
                pl.BlockSpec((block_b, 2 * H), lambda i, k: (i, 0)),
            ],
            out_specs=[
                pl.BlockSpec((block_b, H), lambda i, k: (i, 0)),
                pl.BlockSpec((block_b, H), lambda i, k: (i, 0)),
            ],
            scratch_shapes=[
                pltpu.VMEM((block_b, H), jnp.float32),   # masked-sum accumulator
                pltpu.VMEM((block_b, 1), jnp.float32),   # mask-count accumulator
            ],
        ),
        compiler_params=pltpu.CompilerParams(
            dimension_semantics=("parallel", "arbitrary"),
            vmem_limit_bytes=48 * 1024 * 1024,
        ),
    )(token_embeddings, mask_f, w_fused, date_bias)
    return mu, std


def init_params(key, hidden_size, pos_dim):
    ks = jax.random.split(key, 6)
    scale = 1.0 / jnp.sqrt(hidden_size + pos_dim)
    return {
        # Linear(hidden+P -> hidden), stored as [in, out] (pre-transposed) and
        # split row-wise into the hidden part and the dates part.
        "wmu_h":  (jax.random.normal(ks[0], (hidden_size, hidden_size)) * scale).astype(jnp.float32),
        "wmu_p":  (jax.random.normal(ks[1], (pos_dim, hidden_size)) * scale).astype(jnp.float32),
        "bmu":    (jax.random.normal(ks[2], (1, hidden_size)) * scale).astype(jnp.float32),
        "wvar_h": (jax.random.normal(ks[3], (hidden_size, hidden_size)) * scale).astype(jnp.float32),
        "wvar_p": (jax.random.normal(ks[4], (pos_dim, hidden_size)) * scale).astype(jnp.float32),
        "bvar":   (jax.random.normal(ks[5], (1, hidden_size)) * scale).astype(jnp.float32),
    }


def reference_forward(token_embeddings, attention_mask, dates, params):
    tok = token_embeddings.astype(jnp.float32)
    mask = attention_mask.astype(jnp.float32)
    pooled = jnp.sum(tok * mask[:, :, None], axis=1) / \
        jnp.maximum(jnp.sum(mask, axis=1, keepdims=True), 1e-9)
    emb = jnp.concatenate([pooled, dates], axis=-1)
    w_mu = jnp.concatenate([params["wmu_h"], params["wmu_p"]], axis=0)
    w_var = jnp.concatenate([params["wvar_h"], params["wvar_p"]], axis=0)
    mu = jnp.tanh(emb @ w_mu + params["bmu"])
    std = jnp.sqrt(jnp.exp(emb @ w_var + params["bvar"]))
    return mu, std


if __name__ == "__main__":
    B, S, H, P = 16, 32, 128, POSITIONAL_ENCODING_DIM

    key = jax.random.PRNGKey(0)
    k_tok, k_mask, k_dates, k_params = jax.random.split(key, 4)

    # Backbone output streamed in its native bf16 (halves the dominant HBM read).
    token_embeddings = jax.random.normal(
        k_tok, (B, S, H), dtype=jnp.float32).astype(jnp.bfloat16)
    attention_mask = (jax.random.uniform(k_mask, (B, S)) > 0.3).astype(jnp.int32)
    dates = jax.random.normal(k_dates, (B, P), dtype=jnp.float32)
    params = init_params(k_params, H, P)

    # Small explicit blocks so the test exercises a real (parallel-B,
    # arbitrary-S) grid with cross-step accumulation: grid = (2, 4).
    mu, std = gauss_forward(token_embeddings, attention_mask, dates, params,
                            block_b=8, block_s=8)
    jax.block_until_ready((mu, std))

    mu_ref, std_ref = reference_forward(token_embeddings, attention_mask, dates, params)
    # Tolerances allow for MXU default-precision / accumulation-order
    # differences between the fused kernel path and the XLA reference.
    assert jnp.allclose(mu, mu_ref, atol=1e-3), "mu mismatch"
    assert jnp.allclose(std, std_ref, atol=1e-3, rtol=1e-3), "std mismatch"

    print("KERNEL_OK")
</pallas_src>

<mosaic_0001>
module attributes {stable_mosaic.version = 11 : i64} {
  func.func @gauss_kernel(%arg0: i32, %arg1: i32, %arg2: memref<8x8x128xbf16, #tpu.memory_space<vmem>>, %arg3: memref<8x8x1xf32, #tpu.memory_space<vmem>>, %arg4: memref<128x256xf32, #tpu.memory_space<vmem>>, %arg5: memref<8x256xf32, #tpu.memory_space<vmem>>, %arg6: memref<8x128xf32, #tpu.memory_space<vmem>>, %arg7: memref<8x128xf32, #tpu.memory_space<vmem>>, %arg8: memref<8x128xf32, #tpu.memory_space<vmem>>, %arg9: memref<8x1xf32, #tpu.memory_space<vmem>>) attributes {dimension_semantics = [#tpu.dimension_semantics<parallel>, #tpu.dimension_semantics<arbitrary>], iteration_bounds = array<i64: 2, 4>, scalar_prefetch = 0 : i64, scratch_operands = 2 : i64, tpu.core_type = #tpu.core_type<tc>, window_params = [{transform_indices = @transform_0, window_bounds = array<i64: 8, 8, 128>}, {transform_indices = @transform_1, window_bounds = array<i64: 8, 8, 1>}, {pipeline_mode = #tpu.pipeline_mode<synchronous>, transform_indices = @transform_2, window_bounds = array<i64: 128, 256>}, {transform_indices = @transform_3, window_bounds = array<i64: 8, 256>}, {transform_indices = @transform_4, window_bounds = array<i64: 8, 128>}, {transform_indices = @transform_5, window_bounds = array<i64: 8, 128>}]} {
    %c0_i32 = arith.constant 0 : i32
    %0 = arith.cmpi eq, %arg1, %c0_i32 : i32
    %1 = arith.extui %0 : i1 to i32
    %c0_i32_0 = arith.constant 0 : i32
    %2 = arith.cmpi ne, %1, %c0_i32_0 : i32
    scf.if %2 {
      %cst_16 = arith.constant 0.000000e+00 : f32
      %19 = vector.broadcast %cst_16 : f32 to vector<8x128xf32>
      %c0_17 = arith.constant 0 : index
      %c0_18 = arith.constant 0 : index
      %20 = vector.load %arg8[%c0_17, %c0_18] : memref<8x128xf32, #tpu.memory_space<vmem>>, vector<8x128xf32>
      tpu.vector_store %arg8[%c0_17, %c0_18], %19 {strides = array<i32>} : memref<8x128xf32, #tpu.memory_space<vmem>>, vector<8x128xf32>,
      %cst_19 = arith.constant 0.000000e+00 : f32
      %21 = vector.broadcast %cst_19 : f32 to vector<8x1xf32>
      %c0_20 = arith.constant 0 : index
      %c0_21 = arith.constant 0 : index
      %22 = vector.load %arg9[%c0_20, %c0_21] : memref<8x1xf32, #tpu.memory_space<vmem>>, vector<8x1xf32>
      tpu.vector_store %arg9[%c0_20, %c0_21], %21 {strides = array<i32>} : memref<8x1xf32, #tpu.memory_space<vmem>>, vector<8x1xf32>,
    } else {
    }
    %c0 = arith.constant 0 : index
    %c0_1 = arith.constant 0 : index
    %c0_2 = arith.constant 0 : index
    %3 = vector.load %arg2[%c0, %c0_1, %c0_2] : memref<8x8x128xbf16, #tpu.memory_space<vmem>>, vector<8x8x128xbf16>
    %4 = arith.extf %3 : vector<8x8x128xbf16> to vector<8x8x128xf32>
    %c0_3 = arith.constant 0 : index
    %c0_4 = arith.constant 0 : index
    %c0_5 = arith.constant 0 : index
    %5 = vector.load %arg3[%c0_3, %c0_4, %c0_5] : memref<8x8x1xf32, #tpu.memory_space<vmem>>, vector<8x8x1xf32>
    %c0_6 = arith.constant 0 : index
    %c0_7 = arith.constant 0 : index
    %6 = vector.load %arg8[%c0_6, %c0_7] : memref<8x128xf32, #tpu.memory_space<vmem>>, vector<8x128xf32>
    %7 = vector.broadcast %5 : vector<8x8x1xf32> to vector<8x8x128xf32>
    %8 = arith.mulf %4, %7 : vector<8x8x128xf32>
    %cst = arith.constant dense<0.000000e+00> : vector<8x128xf32>
    %9 = vector.multi_reduction <add>, %8, %cst [1] : vector<8x8x128xf32> to vector<8x128xf32>
    %10 = arith.addf %6, %9 : vector<8x128xf32>
    %c0_8 = arith.constant 0 : index
    %c0_9 = arith.constant 0 : index
    %11 = vector.load %arg8[%c0_8, %c0_9] : memref<8x128xf32, #tpu.memory_space<vmem>>, vector<8x128xf32>
    tpu.vector_store %arg8[%c0_8, %c0_9], %10 {strides = array<i32>} : memref<8x128xf32, #tpu.memory_space<vmem>>, vector<8x128xf32>,
    %c0_10 = arith.constant 0 : index
    %c0_11 = arith.constant 0 : index
    %12 = vector.load %arg9[%c0_10, %c0_11] : memref<8x1xf32, #tpu.memory_space<vmem>>, vector<8x1xf32>
    %cst_12 = arith.constant dense<0.000000e+00> : vector<8x1xf32>
    %13 = vector.multi_reduction <add>, %5, %cst_12 [1] : vector<8x8x1xf32> to vector<8x1xf32>
    %14 = arith.addf %12, %13 : vector<8x1xf32>
    %c0_13 = arith.constant 0 : index
    %c0_14 = arith.constant 0 : index
    %15 = vector.load %arg9[%c0_13, %c0_14] : memref<8x1xf32, #tpu.memory_space<vmem>>, vector<8x1xf32>
    tpu.vector_store %arg9[%c0_13, %c0_14], %14 {strides = array<i32>} : memref<8x1xf32, #tpu.memory_space<vmem>>, vector<8x1xf32>,
    %c3_i32 = arith.constant 3 : i32
    %16 = arith.cmpi eq, %arg1, %c3_i32 : i32
    %17 = arith.extui %16 : i1 to i32
    %c0_i32_15 = arith.constant 0 : i32
    %18 = arith.cmpi ne, %17, %c0_i32_15 : i32
    scf.if %18 {
      %c0_16 = arith.constant 0 : index
      %c0_17 = arith.constant 0 : index
      %19 = vector.load %arg9[%c0_16, %c0_17] : memref<8x1xf32, #tpu.memory_space<vmem>>, vector<8x1xf32>
      %cst_18 = arith.constant 9.99999971E-10 : f32
      %20 = vector.broadcast %cst_18 : f32 to vector<8x1xf32>
      %21 = arith.maximumf %19, %20 : vector<8x1xf32>
      %c0_19 = arith.constant 0 : index
      %c0_20 = arith.constant 0 : index
      %22 = vector.load %arg8[%c0_19, %c0_20] : memref<8x128xf32, #tpu.memory_space<vmem>>, vector<8x128xf32>
      %23 = tpu.reciprocal %21 : vector<8x1xf32> -> vector<8x1xf32>
      %24 = vector.broadcast %23 : vector<8x1xf32> to vector<8x128xf32>
      %25 = arith.mulf %22, %24 : vector<8x128xf32>
      %c0_21 = arith.constant 0 : index
      %c0_22 = arith.constant 0 : index
      %26 = vector.load %arg4[%c0_21, %c0_22] : memref<128x256xf32, #tpu.memory_space<vmem>>, vector<128x256xf32>
      %cst_23 = arith.constant dense<0.000000e+00> : vector<8x256xf32>
      %27 = tpu.matmul %25, %26, %cst_23 {dimension_numbers = #tpu.dot_dimension_numbers<[1], [0], [0], [1], [0, 0, 1, 1], [], []>} : vector<8x128xf32>, vector<128x256xf32>, vector<8x256xf32> -> vector<8x256xf32>
      %c0_24 = arith.constant 0 : index
      %c0_25 = arith.constant 0 : index
      %28 = vector.load %arg5[%c0_24, %c0_25] : memref<8x256xf32, #tpu.memory_space<vmem>>, vector<8x256xf32>
      %29 = arith.addf %27, %28 : vector<8x256xf32>
      %30 = vector.extract_strided_slice %29 {offsets = [0, 0], sizes = [8, 128], strides = [1, 1]} : vector<8x256xf32> to vector<8x128xf32>
      %31 = math.tanh %30 : vector<8x128xf32>
      %c0_26 = arith.constant 0 : index
      %c0_27 = arith.constant 0 : index
      %32 = vector.load %arg6[%c0_26, %c0_27] : memref<8x128xf32, #tpu.memory_space<vmem>>, vector<8x128xf32>
      tpu.vector_store %arg6[%c0_26, %c0_27], %31 {strides = array<i32>} : memref<8x128xf32, #tpu.memory_space<vmem>>, vector<8x128xf32>,
      %33 = vector.extract_strided_slice %29 {offsets = [0, 128], sizes = [8, 128], strides = [1, 1]} : vector<8x256xf32> to vector<8x128xf32>
      %cst_28 = arith.constant 5.000000e-01 : f32
      %34 = vector.broadcast %cst_28 : f32 to vector<8x128xf32>
      %35 = arith.mulf %34, %33 : vector<8x128xf32>
      %36 = math.exp %35 : vector<8x128xf32>
      %c0_29 = arith.constant 0 : index
      %c0_30 = arith.constant 0 : index
      %37 = vector.load %arg7[%c0_29, %c0_30] : memref<8x128xf32, #tpu.memory_space<vmem>>, vector<8x128xf32>
      tpu.vector_store %arg7[%c0_29, %c0_30], %36 {strides = array<i32>} : memref<8x128xf32, #tpu.memory_space<vmem>>, vector<8x128xf32>,
    } else {
    }
    return
  }
  func.func @transform_0(%arg0: i32, %arg1: i32) -> (i32, i32, i32) {
    %c0_i32 = arith.constant 0 : i32
    %c0_i32_0 = arith.constant 0 : i32
    return %arg0, %arg1, %c0_i32 : i32, i32, i32
  }
  func.func @transform_1(%arg0: i32, %arg1: i32) -> (i32, i32, i32) {
    %c0_i32 = arith.constant 0 : i32
    %c0_i32_0 = arith.constant 0 : i32
    return %arg0, %arg1, %c0_i32 : i32, i32, i32
  }
  func.func @transform_2(%arg0: i32, %arg1: i32) -> (i32, i32) {
    %c0_i32 = arith.constant 0 : i32
    %c0_i32_0 = arith.constant 0 : i32
    %c0_i32_1 = arith.constant 0 : i32
    return %c0_i32, %c0_i32_0 : i32, i32
  }
  func.func @transform_3(%arg0: i32, %arg1: i32) -> (i32, i32) {
    %c0_i32 = arith.constant 0 : i32
    %c0_i32_0 = arith.constant 0 : i32
    return %arg0, %c0_i32 : i32, i32
  }
  func.func @transform_4(%arg0: i32, %arg1: i32) -> (i32, i32) {
    %c0_i32 = arith.constant 0 : i32
    %c0_i32_0 = arith.constant 0 : i32
    return %arg0, %c0_i32 : i32, i32
  }
  func.func @transform_5(%arg0: i32, %arg1: i32) -> (i32, i32) {
    %c0_i32 = arith.constant 0 : i32
    %c0_i32_0 = arith.constant 0 : i32
    return %arg0, %c0_i32 : i32, i32
  }
}

</mosaic_0001>

<bundles_post_ra>
// kernel: tpu_custom_call.1
= control target key start
LH: loop header
LB: loop body
LE: loop exit
PB: predicated region body
PF: predicated region fallthrough
CT: control target
= control target key end

     0   :  { %s1787_s0 = inlined_call_operand.vmem [shape: bf16[16,32,128], index: 0, kind: input, shape index: {}]   ;;  %s1788_s1 = inlined_call_operand.vmem [shape: f32[16,32,1], index: 1, kind: input, shape index: {}]   ;;  %s1789_s2 = inlined_call_operand.vmem [shape: f32[128,256], index: 2, kind: input, shape index: {}]   ;;  %s1790_s3 = inlined_call_operand.hbm [shape: f32[16,256], index: 3, kind: input, shape index: {}]   ;;  %s1791_s4 = inlined_call_operand.hbm [shape: f32[16,128], index: 4, kind: output, shape index: {0}]   ;;  %s1792_s5 = inlined_call_operand.hbm [shape: f32[16,128], index: 5, kind: output, shape index: {1}]  }
   0x1   :  { %1798 = sst [smem:[#allocation19_spill]] %s1787_s0 }
   0x2   :  { %1799 = sst [smem:[#allocation20_spill]] %s1788_s1 }
   0x3   :  { %11 = vsyncpa [#allocation7], 0 }
   0x4   :  { %13 = vsyncpa [#allocation7 + $0x1], 0 }
   0x5   :  { %14 = vsyncpa [#allocation8], 0 }
   0x6   :  { %16 = vsyncpa [#allocation8 + $0x1], 0 }
   0x7   :  { %17 = vsyncpa [#allocation11], 0 }
   0x8   :  { %19 = vsyncpa [#allocation11 + $0x1], 0  ;;  %s1389_s18 = smov 0   ;;  %s1391_s19 = smov 0  }
   0x9   :  { %s1393_s20 = smov 0   ;;  %s1395_s21 = smov 0  }
   0xa   :  { %s1397_s22 = smov 0   ;;  %s1399_s23 = smov 0  }
   0xb   :  { %s1401_s24 = smov 0   ;;  %s1403_s25 = smov 0  }
   0xc   :  { %s1405_s26 = smov 0   ;;  %s1407_s27 = smov 0  }
   0xd LB: > { %1800 = sst [smem:[#allocation15_spill]] %s1346_s26  ;;  %s986_s28 = sadd.s32 4294967295, %s1350_s27   ;;  %s1350_s27 = sphi %s1407_s27, %s25_s27   ;;  %s1346_s26 = sphi %s1405_s26, %s1817_s26   ;;  %s1342_s25 = sphi %s1403_s25, %s1824_s25   ;;  %s1338_s24 = sphi %s1401_s24, %s1815_s24   ;;  %s1334_s23 = sphi %s1399_s23, %s1823_s23   ;;  %s1330_s22 = sphi %s1397_s22, %s1822_s22   ;;  %s1326_s21 = sphi %s1395_s21, %s1821_s21   ;;  %s1322_s20 = sphi %s1393_s20, %s1820_s20   ;;  %s1318_s19 = sphi %s1391_s19, %s1819_s19   ;;  %s1314_s18 = sphi %s1389_s18, %s1818_s18  }
   0xe   : > { %s987_s29 = sadd.s32 4294967294, %s1350_s27   ;;  %s34_s30 = sadd.s32 1, %s1342_s25 }
   0xf   : > { %s37_s6 = sadd.s32 1, %s1346_s26  ;;  %p35_p0 = scmp.ge.s32.totalorder %s34_s30, 4 }
  0x10   : > { %s46_s7 = sadd.s32 1, %s1330_s22  ;;  %p53_p1 = scmp.ne.s32.totalorder %s1330_s22, %s1326_s21 }
  0x11   : > { %p54_p2 = scmp.eq.s32.totalorder %s1350_s27, 0  ;;  %s1826_s30 = smov (%p35_p0, %s34_s30), 0 }
  0x12   : > { %1801 = sst [smem:[#allocation16_spill]] %s1826_s30  ;;  %s1828_s6 = smov (!%p35_p0, %s37_s6), %s1346_s26 }
  0x13   : > { %s42_s8 = ssub.s32 %s1342_s25, %s1826_s30  ;;  %p1452_p3 = por %p54_p2, %p53_p1 }
  0x14   : > { %p39_p4 = scmp.ge.s32.totalorder %s1828_s6, 2  ;;  %s121_s10 = sadd.s32 1, %s1322_s20 }
  0x15   : > { %p128_p5 = scmp.ne.s32.totalorder %s1322_s20, %s1318_s19  ;;  %p134_p6 = scmp.ne.s32.totalorder %s1318_s19, %s1314_s18 }
  0x16   : > { %s1830_s6 = smov (%p39_p4, %s1828_s6), 0  ;;  %p135_p8 = scmp.eq.s32.totalorder %s986_s28, 0 }
  0x17   : > { %1803 = sst [smem:[#allocation17_spill]] %s1830_s6  ;;  %p1466_p7 = por %p128_p5, %p54_p2 }
  0x18   : > { %s41_s12 = ssub.s32 %s1346_s26, %s1830_s6  ;;  %p158_p9 = scmp.eq.s32.totalorder %s986_s28, 7 }
  0x19   : > { %s43_s13 = sor.u32 %s42_s8, %s41_s12  ;;  %p119_p10 = scmp.eq.s32.totalorder %s41_s12, 0 }
  0x1a   : > { %p44_p11 = scmp.eq.s32.totalorder %s43_s13, 0  ;;  %p1475_p12 = por %p135_p8, %p134_p6 }
  0x1b   : > { %s1480_s15 = scalar_select %p119_p10, %s1322_s20, %s121_s10  }
  0x1c   : > { %s1805_s14 = scalar_select %p1475_p12, 1, 0 }
  0x1d   : > { %s1483_s16 = scalar_select %p44_p11, %s1330_s22, %s46_s7  }
  0x1e   : > { %p1488_p13 = por %p158_p9, %p128_p5  ;;  %p164_p0 = scmp.eq.s32.totalorder %s987_s29, 7 }
  0x1f   : > { %1806 = sst [smem:[#allocation18_spill]] %s1483_s16  ;;  %p989_p2 = scmp.ge.s32.totalorder %s1350_s27, 8 }
  0x20   : > { %s1807_s17 = scalar_select %p1488_p13, 1, 0 }
  0x21   : > { %p1495_p1 = por %p164_p0, %p134_p6  ;;  %209 = sbr.rel (%p989_p2) target bundleno = 98 (0x62), region = 20 }
  0x23   : > { %s1808_s28 = scalar_select %p1495_p1, 1, 0 }
  0x28   : > { %212 = sbr.rel (!%p1452_p3) target bundleno = 55 (0x37), region = 24  ;;  %s214_s7 = sand.u32 (%p1452_p3), 1, %s1330_s22  }
  0x29   : > { %s1015_s8 = sshll.u32 (%p1452_p3), %s1346_s26, 5  ;;  %s990_s10 = sshll.u32 (%p1452_p3), %s214_s7, 5 }
  0x2a   : > { %s219_s12 = sadd.s32 (%p1452_p3), %s1342_s25, %s1015_s8  ;;  %s1809_s0 = sld [smem:[#allocation19_spill]] (%p1452_p3) }
  0x2b   : > { %s993_s13 = sshll.u32 (%p1452_p3), %s219_s12, 2  ;;  %s216_s16 = scalar_lea.vmem (%p1452_p3), [#allocation4], %s990_s10 }
  0x30   : > { %s221_s30 = scalar_lea.vmem %s1809_s0, %s993_s13 }
  0x31   : > { %v237_v0 = vld [vmem:[%s221_s30] sm:$0xf]  ;;  %v239_v1 = vld [vmem:[%s221_s30 + $0x10] sm:$0xf] }
  0x32   : > { %v241_v2 = vld [vmem:[%s221_s30 + $0x20] sm:$0xf]  ;;  %238 = vst [vmem:[%s216_s16] sm:$0xf] %v237_v0  ;;  %240 = vst [vmem:[%s216_s16 + $0x4] sm:$0xf] %v239_v1 }
  0x33   : > { %242 = vst [vmem:[%s216_s16 + $0x8] sm:$0xf] %v241_v2  ;;  %v243_v3 = vld [vmem:[%s221_s30 + $0x30] sm:$0xf]  ;;  %v245_v4 = vld [vmem:[%s221_s30 + $0x40] sm:$0xf] }
  0x34   : > { %v247_v5 = vld [vmem:[%s221_s30 + $0x50] sm:$0xf]  ;;  %244 = vst [vmem:[%s216_s16 + $0xc] sm:$0xf] %v243_v3  ;;  %246 = vst [vmem:[%s216_s16 + $0x10] sm:$0xf] %v245_v4 }
  0x35   : > { %248 = vst [vmem:[%s216_s16 + $0x14] sm:$0xf] %v247_v5  ;;  %v249_v6 = vld [vmem:[%s221_s30 + $0x60] sm:$0xf]  ;;  %v251_v7 = vld [vmem:[%s221_s30 + $0x70] sm:$0xf] }
  0x36   : > { %250 = vst [vmem:[%s216_s16 + $0x18] sm:$0xf] %v249_v6  ;;  %252 = vst [vmem:[%s216_s16 + $0x1c] sm:$0xf] %v251_v7 }
  0x37 PF: > { %291 = sbr.rel (!%p1452_p3) target bundleno = 73 (0x49), region = 65  ;;  %s293_s6 = sand.u32 (%p1452_p3), 1, %s1330_s22  }
  0x38   : > { %s1016_s7 = sshll.u32 (%p1452_p3), %s1346_s26, 5  ;;  %s994_s8 = sshll.u32 (%p1452_p3), %s293_s6, 6 }
  0x39   : > { %s298_s10 = sadd.s32 (%p1452_p3), %s1342_s25, %s1016_s7  ;;  %s1810_s1 = sld [smem:[#allocation20_spill]] (%p1452_p3) }
  0x3a   : > { %s997_s12 = sshll.u32 (%p1452_p3), %s298_s10, 3  ;;  %s295_s30 = scalar_lea.vmem (%p1452_p3), [#allocation5], %s994_s8 }
  0x3f   : > { %s300_s0 = scalar_lea.vmem %s1810_s1, %s997_s12 }
  0x40   : > { %v342_v8 = vld [vmem:[%s300_s0] sm:$0xff] }
  0x41   : > { %v344_v9 = vld [vmem:[%s300_s0 + $0x20] sm:$0xff]  ;;  %343 = vst [vmem:[%s295_s30] sm:$0xff] %v342_v8 }
  0x42   : > { %v346_v10 = vld [vmem:[%s300_s0 + $0x40] sm:$0xff]  ;;  %345 = vst [vmem:[%s295_s30 + $0x8] sm:$0xff] %v344_v9 }
  0x43   : > { %347 = vst [vmem:[%s295_s30 + $0x10] sm:$0xff] %v346_v10  ;;  %v348_v11 = vld [vmem:[%s300_s0 + $0x60] sm:$0xff] }
  0x44   : > { %v350_v12 = vld [vmem:[%s300_s0 + $0x80] sm:$0xff]  ;;  %349 = vst [vmem:[%s295_s30 + $0x18] sm:$0xff] %v348_v11 }
  0x45   : > { %v352_v13 = vld [vmem:[%s300_s0 + $0xa0] sm:$0xff]  ;;  %351 = vst [vmem:[%s295_s30 + $0x20] sm:$0xff] %v350_v12 }
  0x46   : > { %353 = vst [vmem:[%s295_s30 + $0x28] sm:$0xff] %v352_v13  ;;  %v354_v14 = vld [vmem:[%s300_s0 + $0xc0] sm:$0xff] }
  0x47   : > { %v356_v15 = vld [vmem:[%s300_s0 + $0xe0] sm:$0xff]  ;;  %355 = vst [vmem:[%s295_s30 + $0x30] sm:$0xff] %v354_v14 }
  0x48   : > { %357 = vst [vmem:[%s295_s30 + $0x38] sm:$0xff] %v356_v15 }
  0x49 PF: > { %s364_s9 = sand.u32 1, %s1322_s20   ;;  %s1017_s16 = sshll.u32 %s1346_s26, 8 }
  0x4a   : > { %s998_s6 = sshll.u32 %s364_s9, 4  ;;  %s1521_s10 = scalar_lea.hbm %s1790_s3, %s1017_s16 }
  0x4b   : > { %s368_s12 = scalar_lea.vmem [#allocation6], %s998_s6  ;;  %s365_s13 = scalar_lea.sflag [#allocation7], %s364_s9 }
  0x4c   : > { %s376_s0 = sshll.u32 %s368_s12, 4  ;;  %s1176_s29 = scalar_lea.hbm %s1521_s10, 256  ;;  %s377_s0 = int_to_ptr.vmem [resolvable:$true] %s376_s0 }
  0x4d   : > { %p1177_p3 = scmp.ne.s32.totalorder %s1521_s10, %s1176_s29  ;;  %s1180_s26 = scalar_lea.hbm %s1790_s3, 512 }
  0x4e   : > { %p1181_p6 = scmp.lt.u32.totalorder %s1521_s10, %s1790_s3  ;;  %p1182_p8 = scmp.lt.u32.totalorder %s1180_s26, %s1176_s29 }
  0x4f   : > { %p1178_p4 = pnand %p1177_p3, %p1466_p7  ;;  %p1184_p10 = scmp.lt.u32.totalorder %s1176_s29, %s1521_s10 }
  0x50   : > { %p1183_p9 = por %p1182_p8, %p1181_p6 }
  0x51   : > { %p1179_p5 = pneg %p1178_p4 }
  0x52   : > { %p1185_p11 = por %p1184_p10, %p1183_p9 }
  0x54   : > { %p1186_p0 = pnand %p1185_p11, %p1179_p5 }
  0x56   : > { %1189 = shalt.err (!%p1186_p0)
}
  0x57   : > { %s1190_s9 = scalar_lea.vmem %s377_s0, 256  ;;  %s1352_s6 = smov [#allocation6]  }
  0x58   : > { %p1191_p2 = scmp.ne.s32.totalorder %s377_s0, %s1190_s9  ;;  %s1194_s8 = sshll.u32 %s1352_s6, 4  ;;  %s1195_s8 = int_to_ptr.vmem [resolvable:$false] %s1194_s8 }
  0x59   : > { %s1196_s1 = scalar_lea.vmem %s1195_s8, 512  ;;  %p1197_p1 = scmp.lt.s32.totalorder %s377_s0, %s1195_s8 }
  0x5a   : > { %p1192_p3 = pnand %p1191_p2, %p1466_p7  ;;  %p1198_p13 = scmp.lt.s32.totalorder %s1196_s1, %s1190_s9 }
  0x5c   : > { %p1193_p4 = pneg %p1192_p3  ;;  %p1199_p12 = por %p1198_p13, %p1197_p1 }
  0x5e   : > { %p1200_p6 = pnand %p1199_p12, %p1193_p4 }
  0x60   : > { %1203 = shalt.err (!%p1200_p6)
}
  0x61   : > { %1069 = dma.hbm_to_vmem [thread:$0]  (%p1466_p7), %s1521_s10, 256, %s377_s0, %s365_s13  }
  0x62 PF: > { %p1001_p5 = scmp.ge.s32.totalorder %s1350_s27, 1  ;;  %p381_p8 = scmp.lt.s32.totalorder %s1350_s27, 9 }
  0x64   : > { %p382_p9 = pnand %p1001_p5, %p381_p8 }
  0x65   : > { %s388_s26 = sand.u32 (!%p382_p9), 1, %s1326_s21   ;;  %s1544_s12 = sand.u32 (!%p382_p9), 1, %s1318_s19  }
  0x66   : > { %385 = sbr.rel (%p382_p9) target bundleno = 681 (0x2a9), region = 107  ;;  %s1002_s29 = sshll.u32 (!%p382_p9), %s388_s26, 5 }
  0x67   : > { %s1003_s30 = sshll.u32 (!%p382_p9), %s388_s26, 6  ;;  %s1004_s11 = sshll.u32 (!%p382_p9), %s1544_s12, 4 }
  0x68   : > { %s1547_s7 = scalar_lea.vmem (!%p382_p9), [#allocation4], %s1002_s29  ;;  %s1549_s10 = scalar_lea.vmem (!%p382_p9), [#allocation5], %s1003_s30 }
  0x69   : > { %s402_s0 = scalar_lea.sflag (!%p382_p9), [#allocation7], %s1544_s12  ;;  %s1552_s13 = scalar_lea.vmem (!%p382_p9), [#allocation6], %s1004_s11 }
  0x6a   : > { %p1811_p7 = scmp.ne.s32.totalorder (!%p382_p9), %s1805_s14, 0 }
  0x6d   : > { %1301 = dma.done.wait (%p1811_p7), %s402_s0, 256  }
  0x6e   : > { %1303 = vsyncadd (%p1811_p7), %s402_s0, 4294967040  ;;  %s1005_s21 = sshll.u32 %s1544_s12, 3  ;;  %p1007_p12 = scmp.ne.s32.totalorder %s1334_s23, 0 }
  0x6f   : > { %s1559_s16 = scalar_lea.vmem [#allocation9], %s1005_s21  ;;  %s1561_s9 = scalar_lea.vmem [#allocation10], %s1005_s21  ;;  %vm452_vm0 = vcmask (!%p1007_p12), 7168   ;;  %v1353_v16 = vmov (!%p1007_p12), 0.0  }
  0x70   : > { %450 = sbr.rel (%p1007_p12) target bundleno = 119 (0x77), region = 123  ;;  %451 = vst [vmem:[#allocation2] sm:$0xff] (!%p1007_p12), %v1353_v16  ;;  %453 = vst.msk [vmem:[#allocation3] sm:$0xff] (!%p1007_p12), %vm452_vm0, %v1353_v16 }
  0x77 PF: > { %v472_v17 = vld [vmem:[%s1549_s10 + $0x10] sm:$0xff]  ;;  %vm601_vm1 = vcmask 7168   ;;  %v470_v18 = vld [vmem:[%s1549_s10] sm:$0xff]  ;;  %v473_v19 = vld [vmem:[%s1549_s10 + $0x18] sm:$0xff]  ;;  %v1354_v20 = vmov 0   ;;  %vm583_vm2 = vcmask 1041409  }
  0x78   : > { %1168 = vset.pattern.permute.xlu1 %v1354_v20  ;;  %1167 = vset.pattern.permute.xlu0 %v1354_v20  ;;  %v616_v21 = vsel %vm601_vm1, %v472_v17, 0.0  ;;  %v602_v22 = vsel %vm601_vm1, %v470_v18, 0.0  ;;  %v623_v23 = vsel %vm601_vm1, %v473_v19, 0.0  ;;  %v471_v24 = vld [vmem:[%s1549_s10 + $0x8] sm:$0xff]  ;;  %v474_v36 = vld [vmem:[%s1549_s10 + $0x20] sm:$0xff]  ;;  %v477_v37 = vld [vmem:[%s1549_s10 + $0x38] sm:$0xff] }
  0x79   : > { %491 = vperm.xlu1 %1168, %v472_v17   ;;  %v617_v25 = vrot.slane %v616_v21, 4  ;;  %481 = vperm.xlu0 %1167, %v470_v18   ;;  %v603_v26 = vrot.slane %v602_v22, 4  ;;  %v624_v27 = vrot.slane %v623_v23, 4  ;;  %v609_v28 = vsel %vm601_vm1, %v471_v24, 0.0  ;;  %v475_v29 = vld [vmem:[%s1549_s10 + $0x28] sm:$0xff]  ;;  %v476_v59 = vld [vmem:[%s1549_s10 + $0x30] sm:$0xff] }
  0x7a   : > { %v610_v30 = vrot.slane %v609_v28, 4  ;;  %v637_v31 = vsel %vm601_vm1, %v475_v29, 0.0  ;;  %v630_v39 = vsel %vm601_vm1, %v474_v36, 0.0  ;;  %v651_v40 = vsel %vm601_vm1, %v477_v37, 0.0  ;;  %p1008_p13 = scmp.ne.s32.totalorder %s1334_s23, 3 }
  0x7b   : > { %v618_v32 = vadd.f32 %v617_v25, %v616_v21  ;;  %v604_v33 = vadd.f32 %v603_v26, %v602_v22  ;;  %v625_v34 = vadd.f32 %v624_v27, %v623_v23  ;;  %v638_v35 = vrot.slane %v637_v31, 4  ;;  %v600_v23 = vld [vmem:[#allocation3] sm:$0xff]  ;;  %v1034_v27 = vld [vmem:[%s1547_s7 + $0x8] sm:$0xff]  }
  0x7c   : > { %v611_v38 = vadd.f32 %v610_v30, %v609_v28  ;;  %v631_v46 = vrot.slane %v630_v39, 4  ;;  %v652_v47 = vrot.slane %v651_v40, 4  ;;  %v644_v63 = vsel %vm601_vm1, %v476_v59, 0.0  ;;  %v1019_v28 = vld [vmem:[%s1547_s7] sm:$0xff]  }
  0x7d   : > { %v619_v41 = vrot.slane %v618_v32, 2  ;;  %v605_v42 = vrot.slane %v604_v33, 2  ;;  %v626_v43 = vrot.slane %v625_v34, 2  ;;  %496 = vperm.xlu1 %1168, %v473_v19   ;;  %486 = vperm.xlu0 %1167, %v471_v24   ;;  %v639_v44 = vadd.f32 %v638_v35, %v637_v31 }
  0x7e   : > { %v612_v45 = vrot.slane %v611_v38, 2  ;;  %v632_v53 = vadd.f32 %v631_v46, %v630_v39  ;;  %v653_v54 = vadd.f32 %v652_v47, %v651_v40  ;;  %v645_v5 = vrot.slane %v644_v63, 4  ;;  %v1035_v39 = vld [vmem:[%s1547_s7 + $0x10] sm:$0xff]  }
  0x7f   : > { %v620_v48 = vadd.f32 %v619_v41, %v618_v32  ;;  %v606_v49 = vadd.f32 %v605_v42, %v604_v33  ;;  %v627_v50 = vadd.f32 %v626_v43, %v625_v34  ;;  %v640_v51 = vrot.slane %v639_v44, 2 }
  0x80   : > { %v613_v52 = vadd.f32 %v612_v45, %v611_v38  ;;  %v633_v61 = vrot.slane %v632_v53, 2  ;;  %v654_v62 = vrot.slane %v653_v54, 2  ;;  %vm585_vm3 = vcmask 1042434  }
  0x81   : > { %v621_v55 = vrot.slane %v620_v48, 1  ;;  %v607_v56 = vrot.slane %v606_v49, 1  ;;  %v628_v57 = vrot.slane %v627_v50, 1  ;;  %v641_v58 = vadd.f32 %v640_v51, %v639_v44  ;;  %506 = vperm.xlu1 %1168, %v475_v29   ;;  %501 = vperm.xlu0 %1167, %v474_v36  }
  0x82   : > { %v614_v60 = vrot.slane %v613_v52, 1  ;;  %v634_v4 = vadd.f32 %v633_v61, %v632_v53  ;;  %v655_v7 = vadd.f32 %v654_v62, %v653_v54  ;;  %v646_v10 = vadd.f32 %v645_v5, %v644_v63 }
  0x83   : > { %v622_v0 = vadd.f32 %v621_v55, %v620_v48  ;;  %v608_v1 = vadd.f32 %v607_v56, %v606_v49  ;;  %v629_v2 = vadd.f32 %v628_v57, %v627_v50  ;;  %v642_v6 = vrot.slane %v641_v58, 1 }
  0x84   : > { %v615_v3 = vadd.f32 %v614_v60, %v613_v52  ;;  %v635_v9 = vrot.slane %v634_v4, 1  ;;  %vm587_vm4 = vcmask 1043459   ;;  %v647_v14 = vrot.slane %v646_v10, 2  ;;  %v1036_v52 = vld [vmem:[%s1547_s7 + $0x18] sm:$0xff]  }
  0x85   : > { %516 = vperm.xlu1 %1168, %v477_v37   ;;  %511 = vperm.xlu0 %1167, %v476_v59   ;;  %v643_v15 = vadd.f32 %v642_v6, %v641_v58  ;;  %vm589_vm5 = vcmask 1044484   ;;  %v656_v16 = vrot.slane %v655_v7, 1  ;;  %vm591_vm6 = vcmask 1045509  }
  0x86   : > { %v666_v8 = vsel %vm583_vm2, %v615_v3, %v608_v1  ;;  %v636_v12 = vadd.f32 %v635_v9, %v634_v4  ;;  %v648_v18 = vadd.f32 %v647_v14, %v646_v10  ;;  %vm593_vm7 = vcmask 1046534  }
  0x87   : > { %v667_v11 = vsel %vm585_vm3, %v622_v0, %v666_v8  ;;  %v657_v20 = vadd.f32 %v656_v16, %v655_v7  ;;  %vm595_vm8 = vcmask 1047559   ;;  %v1024_v29 = vunpack.c.l.bf16 %v1034_v27 }
  0x88   : > { %v668_v13 = vsel %vm587_vm4, %v629_v2, %v667_v11  ;;  %v649_v19 = vrot.slane %v648_v18, 1  ;;  %v1020_v30 = vunpack.c.l.bf16 %v1019_v28  ;;  %v1025_v35 = vunpack.c.h.bf16 %v1034_v27 }
  0x89   : > { %v669_v17 = vsel %vm589_vm5, %v636_v12, %v668_v13  ;;  %v1021_v36 = vunpack.c.h.bf16 %v1019_v28  ;;  %v1029_v46 = vunpack.c.h.bf16 %v1035_v39  ;;  %v1028_v47 = vunpack.c.l.bf16 %v1035_v39 }
  0x8a   : > { %v670_v21 = vsel %vm591_vm6, %v643_v15, %v669_v17  ;;  %v650_v22 = vadd.f32 %v649_v19, %v648_v18  ;;  %v1033_v61 = vunpack.c.h.bf16 %v1036_v52  ;;  %v1032_v62 = vunpack.c.l.bf16 %v1036_v52 }
  0x8c   : > { %v671_v24 = vsel %vm593_vm7, %v650_v22, %v670_v21 }
  0x8d   : > { %v672_v25 = vsel %vm595_vm8, %v657_v20, %v671_v24 }
  0x8e   : > { %v674_v26 = vadd.f32 %v672_v25, %v600_v23 }
  0x90   : > { %675 = vst.msk [vmem:[#allocation3] sm:$0xff] %vm601_vm1, %v674_v26 }
  0xf8   : > { %v492_v31 = vpop.permute.xlu1 %491  ;;  %v482_v32 = vpop.permute.xlu0 %481 }
  0xf9   : > { %v521_v33 = vmul.f32 %v1024_v29, %v492_v31  ;;  %v519_v34 = vmul.f32 %v1020_v30, %v482_v32 }
  0xfb   : > { %v539_v37 = vrot.slane %v521_v33, 4  ;;  %v527_v38 = vrot.slane %v519_v34, 4 }
  0xfc   : > { %v497_v40 = vpop.permute.xlu1 %496  ;;  %v487_v41 = vpop.permute.xlu0 %486 }
  0xfd   : > { %v540_v42 = vadd.f32 %v539_v37, %v521_v33  ;;  %v528_v43 = vadd.f32 %v527_v38, %v519_v34  ;;  %v522_v44 = vmul.f32 %v1025_v35, %v497_v40  ;;  %v520_v45 = vmul.f32 %v1021_v36, %v487_v41 }
  0xff   : > { %v541_v48 = vrot.slane %v540_v42, 2  ;;  %v529_v49 = vrot.slane %v528_v43, 2  ;;  %v545_v50 = vrot.slane %v522_v44, 4  ;;  %v533_v51 = vrot.slane %v520_v45, 4 }
 0x100   : > { %v507_v53 = vpop.permute.xlu1 %506  ;;  %v502_v54 = vpop.permute.xlu0 %501 }
 0x101   : > { %v542_v55 = vadd.f32 %v541_v48, %v540_v42  ;;  %v530_v56 = vadd.f32 %v529_v49, %v528_v43  ;;  %v546_v57 = vadd.f32 %v545_v50, %v522_v44  ;;  %v534_v58 = vadd.f32 %v533_v51, %v520_v45  ;;  %v478_v43 = vld [vmem:[#allocation2] sm:$0xff]  ;;  %v680_v48 = vld [vmem:[#allocation3] sm:$0xff] (!%p1008_p13)  ;;  %v693_v50 = vld [vmem:[%s1789_s2 + $0x18] sm:$0xff] (!%p1008_p13) }
 0x102   : > { %v524_v59 = vmul.f32 %v1029_v46, %v507_v53  ;;  %v523_v60 = vmul.f32 %v1028_v47, %v502_v54  ;;  %v691_v49 = vld [vmem:[%s1789_s2 + $0x8] sm:$0xff] (!%p1008_p13)  ;;  %v1355_v51 = vmov (!%p1008_p13), 0   ;;  %v681_v52 = vmax.f32 (!%p1008_p13), %v680_v48, 1e-09  ;;  %v690_v54 = vld [vmem:[%s1789_s2] sm:$0xff] (!%p1008_p13) }
 0x103   : > { %v547_v63 = vrot.slane %v546_v57, 2  ;;  %v535_v0 = vrot.slane %v534_v58, 2  ;;  %v543_v5 = vrot.slane %v542_v55, 1  ;;  %v531_v6 = vrot.slane %v530_v56, 1  ;;  %1169 = vset.pattern.permute.xlu0 (!%p1008_p13), %v1355_v51 }
 0x104   : > { %v557_v1 = vrot.slane %v524_v59, 4  ;;  %v551_v2 = vrot.slane %v523_v60, 4  ;;  %v517_v3 = vpop.permute.xlu1 %516  ;;  %v512_v4 = vpop.permute.xlu0 %511  ;;  %v1037_v53 = vpack.c.bf16 (!%p1008_p13), %v693_v50, %v691_v49  ;;  %1170 = vrcp.f32 (!%p1008_p13), %v681_v52 }
 0x105   : > { %v548_v7 = vadd.f32 %v547_v63, %v546_v57  ;;  %v536_v8 = vadd.f32 %v535_v0, %v534_v58  ;;  %v526_v11 = vmul.f32 %v1033_v61, %v517_v3  ;;  %v525_v12 = vmul.f32 %v1032_v62, %v512_v4  ;;  %v697_v58 = vld [vmem:[%s1789_s2 + $0x38] sm:$0xff] (!%p1008_p13)  ;;  %v699_v62 = vld [vmem:[%s1789_s2 + $0x48] sm:$0xff] (!%p1008_p13)  ;;  %v700_v3 = vld [vmem:[%s1789_s2 + $0x50] sm:$0xff] (!%p1008_p13) }
 0x106   : > { %v558_v9 = vadd.f32 %v557_v1, %v524_v59  ;;  %v552_v10 = vadd.f32 %v551_v2, %v523_v60  ;;  %v544_v19 = vadd.f32 %v543_v5, %v542_v55  ;;  %v532_v20 = vadd.f32 %v531_v6, %v530_v56  ;;  %v692_v55 = vld [vmem:[%s1789_s2 + $0x10] sm:$0xff] (!%p1008_p13)  ;;  %v695_v56 = vld [vmem:[%s1789_s2 + $0x28] sm:$0xff] (!%p1008_p13)  ;;  %v694_v59 = vld [vmem:[%s1789_s2 + $0x20] sm:$0xff] (!%p1008_p13)  ;;  %1038 = vmatprep.subr.bf16.mxu0 (!%p1008_p13), %v1037_v53 }
 0x107   : > { %v549_v13 = vrot.slane %v548_v7, 1  ;;  %v537_v14 = vrot.slane %v536_v8, 1  ;;  %v569_v17 = vrot.slane %v526_v11, 4  ;;  %v563_v18 = vrot.slane %v525_v12, 4  ;;  %v696_v60 = vld [vmem:[%s1789_s2 + $0x30] sm:$0xff] (!%p1008_p13)  ;;  %v701_v63 = vld [vmem:[%s1789_s2 + $0x58] sm:$0xff] (!%p1008_p13) }
 0x108   : > { %v559_v15 = vrot.slane %v558_v9, 2  ;;  %v553_v16 = vrot.slane %v552_v10, 2  ;;  %v1039_v57 = vpack.c.bf16 (!%p1008_p13), %v692_v55, %v690_v54  ;;  %v1041_v61 = vpack.c.bf16 (!%p1008_p13), %v697_v58, %v695_v56  ;;  %v698_v2 = vld [vmem:[%s1789_s2 + $0x40] sm:$0xff] (!%p1008_p13)  ;;  %v703_v4 = vld [vmem:[%s1789_s2 + $0x68] sm:$0xff] (!%p1008_p13)  ;;  %v705_v5 = vld [vmem:[%s1789_s2 + $0x78] sm:$0xff] (!%p1008_p13) }
 0x109   : > { %v538_v21 = vadd.f32 %v537_v14, %v536_v8  ;;  %v570_v24 = vadd.f32 %v569_v17, %v526_v11  ;;  %v564_v25 = vadd.f32 %v563_v18, %v525_v12  ;;  %v550_v26 = vadd.f32 %v549_v13, %v548_v7  ;;  %v702_v8 = vld [vmem:[%s1789_s2 + $0x60] sm:$0xff] (!%p1008_p13)  ;;  %v709_v11 = vld [vmem:[%s1789_s2 + $0x98] sm:$0xff] (!%p1008_p13)  ;;  %v711_v17 = vld [vmem:[%s1789_s2 + $0xa8] sm:$0xff] (!%p1008_p13) }
 0x10a   : > { %v560_v22 = vadd.f32 %v559_v15, %v558_v9  ;;  %v554_v23 = vadd.f32 %v553_v16, %v552_v10  ;;  %1040 = vmatpush1.bf16.msra.mxu0 (!%p1008_p13), %v1039_v57  ;;  %v1043_v0 = vpack.c.bf16 (!%p1008_p13), %v696_v60, %v694_v59  ;;  %v1045_v1 = vpack.c.bf16 (!%p1008_p13), %v701_v63, %v699_v62  ;;  %v704_v9 = vld [vmem:[%s1789_s2 + $0x70] sm:$0xff] (!%p1008_p13)  ;;  %v707_v10 = vld [vmem:[%s1789_s2 + $0x88] sm:$0xff] (!%p1008_p13)  ;;  %v706_v15 = vld [vmem:[%s1789_s2 + $0x80] sm:$0xff] (!%p1008_p13) }
 0x10b   : > { %v584_v27 = vsel %vm583_vm2, %v538_v21, %v532_v20  ;;  %v571_v31 = vrot.slane %v570_v24, 2  ;;  %v565_v32 = vrot.slane %v564_v25, 2  ;;  %1042 = vmatprep.subr.bf16.mxu0 (!%p1008_p13), %v1041_v61  ;;  %v1047_v6 = vpack.c.bf16 (!%p1008_p13), %v700_v3, %v698_v2  ;;  %v708_v16 = vld [vmem:[%s1789_s2 + $0x90] sm:$0xff] (!%p1008_p13)  ;;  %v713_v18 = vld [vmem:[%s1789_s2 + $0xb8] sm:$0xff] (!%p1008_p13) }
 0x10c   : > { %v586_v28 = vsel %vm585_vm3, %v544_v19, %v584_v27  ;;  %v561_v29 = vrot.slane %v560_v22, 1  ;;  %v555_v30 = vrot.slane %v554_v23, 1  ;;  %v1049_v7 = vpack.c.bf16 (!%p1008_p13), %v705_v5, %v703_v4 }
 0x10d   : > { %v588_v34 = vsel %vm587_vm4, %v550_v26, %v586_v28  ;;  %v572_v35 = vadd.f32 %v571_v31, %v570_v24  ;;  %v566_v36 = vadd.f32 %v565_v32, %v564_v25  ;;  %v1051_v12 = vpack.c.bf16 (!%p1008_p13), %v704_v9, %v702_v8  ;;  %v715_v24 = vld [vmem:[%s1789_s2 + $0xc8] sm:$0xff] (!%p1008_p13)  ;;  %v717_v25 = vld [vmem:[%s1789_s2 + $0xd8] sm:$0xff] (!%p1008_p13)  ;;  %v714_v28 = vld [vmem:[%s1789_s2 + $0xc0] sm:$0xff] (!%p1008_p13) }
 0x10e   : > { %v556_v33 = vadd.f32 %v555_v30, %v554_v23  ;;  %v562_v37 = vadd.f32 %v561_v29, %v560_v22  ;;  %1044 = vmatpush1.bf16.msra.mxu0 (!%p1008_p13), %v1043_v0  ;;  %v1171_v13 = vpop.eup (!%p1008_p13), %1170  ;;  %v1053_v14 = vpack.c.bf16 (!%p1008_p13), %v709_v11, %v707_v10  ;;  %v1356_v19 = vmov (!%p1008_p13), 0.0   ;;  %v710_v22 = vld [vmem:[%s1789_s2 + $0xa0] sm:$0xff] (!%p1008_p13)  ;;  %v712_v23 = vld [vmem:[%s1789_s2 + $0xb0] sm:$0xff] (!%p1008_p13)  ;;  %v719_v30 = vld [vmem:[%s1789_s2 + $0xe8] sm:$0xff] (!%p1008_p13) }
 0x10f   : > { %v573_v38 = vrot.slane %v572_v35, 1  ;;  %v567_v40 = vrot.slane %v566_v36, 1  ;;  %1046 = vmatprep.subr.bf16.mxu0 (!%p1008_p13), %v1045_v1  ;;  %686 = vperm.xlu0 (!%p1008_p13), %1169, %v1171_v13   ;;  %v1055_v20 = vpack.c.bf16 (!%p1008_p13), %v708_v16, %v706_v15  ;;  %v1057_v21 = vpack.c.bf16 (!%p1008_p13), %v713_v18, %v711_v17  ;;  %v716_v29 = vld [vmem:[%s1789_s2 + $0xd0] sm:$0xff] (!%p1008_p13)  ;;  %v721_v31 = vld [vmem:[%s1789_s2 + $0xf8] sm:$0xff] (!%p1008_p13) }
 0x110   : > { %v590_v39 = vsel %vm589_vm5, %v556_v33, %v588_v34  ;;  %788 = vmatprep.mubr.f32.mxu0 (!%p1008_p13), %v1356_v19  ;;  %v1059_v26 = vpack.c.bf16 (!%p1008_p13), %v712_v23, %v710_v22  ;;  %v1061_v27 = vpack.c.bf16 (!%p1008_p13), %v717_v25, %v715_v24  ;;  %v1063_v32 = vpack.c.bf16 (!%p1008_p13), %v716_v29, %v714_v28  ;;  %v718_v34 = vld [vmem:[%s1789_s2 + $0xe0] sm:$0xff] (!%p1008_p13) }
 0x111   : > { %v574_v41 = vadd.f32 %v573_v38, %v572_v35  ;;  %v568_v42 = vadd.f32 %v567_v40, %v566_v36  ;;  %v592_v44 = vsel %vm591_vm6, %v562_v37, %v590_v39  ;;  %679 = sbr.rel (%p1008_p13) target bundleno = 632 (0x278), region = 127  ;;  %v1065_v33 = vpack.c.bf16 (!%p1008_p13), %v721_v31, %v719_v30  ;;  %v720_v35 = vld [vmem:[%s1789_s2 + $0xf0] sm:$0xff] (!%p1008_p13) }
 0x112   : > { %1048 = vmatpush1.bf16.msra.mxu0 (!%p1008_p13), %v1047_v6  ;;  %v1067_v36 = vpack.c.bf16 (!%p1008_p13), %v720_v35, %v718_v34  ;;  %v722_v40 = vld [vmem:[%s1552_s13] sm:$0xff] (!%p1008_p13) }
 0x113   : > { %v594_v45 = vsel %vm593_vm7, %v568_v42, %v592_v44  ;;  %1050 = vmatprep.subr.bf16.mxu0 (!%p1008_p13), %v1049_v7 }
 0x114   : > { %v596_v46 = vsel %vm595_vm8, %v574_v41, %v594_v45  ;;  %v723_v41 = vld [vmem:[%s1552_s13 + $0x8] sm:$0xff] (!%p1008_p13) }
 0x115   : > { %v598_v47 = vadd.f32 %v596_v46, %v478_v43 }
 0x116   : > { %1052 = vmatpush1.bf16.msra.mxu0 (!%p1008_p13), %v1051_v12 }
 0x117   : > { %599 = vst [vmem:[#allocation2] sm:$0xff] %v598_v47  ;;  %1054 = vmatprep.subr.bf16.mxu0 (!%p1008_p13), %v1053_v14 }
 0x11a   : > { %1056 = vmatpush1.bf16.msra.mxu0 %v1055_v20 }
 0x11b   : > { %1058 = vmatprep.subr.bf16.mxu0 %v1057_v21 }
 0x11e   : > { %1060 = vmatpush1.bf16.msra.mxu0 %v1059_v26  ;;  %v682_v37 = vld [vmem:[#allocation2] sm:$0xff] }
 0x11f   : > { %1062 = vmatprep.subr.bf16.mxu0 %v1061_v27 }
 0x122   : > { %1064 = vmatpush1.bf16.msra.mxu0 %v1063_v32 }
 0x123   : > { %1066 = vmatprep.subr.bf16.mxu0 %v1065_v33 }
 0x126   : > { %1068 = vmatpush1.bf16.msra.mxu0 %v1067_v36 }
 0x18e   : > { %v687_v38 = vpop.permute.xlu0 %686 }
 0x18f   : > { %v689_v39 = vmul.f32 %v687_v38, %v682_v37 }
 0x191   : > { %789 = vmatmul.mubr.f32.vlgmr.msra.gmra.mrb[0].mxu0 %v689_v39 }
 0x264   : > { %v790_v42 = vpop.f32.mrb[0].mxu0 }
 0x265   : > { %v791_v43 = vadd.f32 %v790_v42, %v722_v40  ;;  %v792_v44 = vpop.f32.mrb[1].mxu0 }
 0x266   : > { %v793_v45 = vadd.f32 %v792_v44, %v723_v41 }
 0x267   : > { %1172 = vtanh.f32 %v791_v43 }
 0x268   : > { %v797_v46 = vmul.f32 0.5, %v793_v45 }
 0x26a   : > { %v798_v47 = vmul.f32 1.442695, %v797_v46 }
 0x26c   : > { %1174 = vpow2.f32 %v798_v47 }
 0x271   : > { %v1173_v48 = vpop.eup %1172 }
 0x272   : > { %796 = vst [vmem:[%s1559_s16] sm:$0xff] %v1173_v48 }
 0x276   : > { %v1175_v49 = vpop.eup %1174 }
 0x277   : > { %800 = vst [vmem:[%s1561_s9] sm:$0xff] %v1175_v49 }
 0x278 PF: > { %s1011_s21 = sshll.u32 %s1338_s24, 7  ;;  %s820_s8 = sshll.u32 %s1559_s16, 4  ;;  %s821_s8 = int_to_ptr.vmem [resolvable:$true] %s820_s8 }
 0x279   : > { %s1706_s6 = scalar_lea.hbm %s1791_s4, %s1011_s21  ;;  %s802_s1 = scalar_lea.sflag [#allocation8], %s1544_s12 }
 0x27a   : > { %s1204_s26 = scalar_lea.vmem %s821_s8, 128  ;;  %p1812_p10 = scmp.ne.s32.totalorder %s1807_s17, 0 }
 0x27b   : > { %p1205_p1 = scmp.ne.s32.totalorder %s821_s8, %s1204_s26  ;;  %s1357_s29 = smov [#allocation9]  }
 0x27c   : > { %s1208_s30 = sshll.u32 %s1357_s29, 4  ;;  %s1209_s30 = int_to_ptr.vmem [resolvable:$false] %s1208_s30 }
 0x27d   : > { %p1206_p11 = pnand %p1205_p1, %p1812_p10  ;;  %s1210_s23 = scalar_lea.vmem %s1209_s30, 256 }
 0x27e   : > { %p1211_p2 = scmp.lt.s32.totalorder %s821_s8, %s1209_s30  ;;  %p1212_p3 = scmp.lt.s32.totalorder %s1210_s23, %s1204_s26 }
 0x27f   : > { %p1207_p0 = pneg %p1206_p11 }
 0x280   : > { %p1213_p4 = por %p1212_p3, %p1211_p2 }
 0x282   : > { %p1214_p6 = pnand %p1213_p4, %p1207_p0 }
 0x284   : > { %1217 = shalt.err (!%p1214_p6)
}
 0x285   : > { %s1218_s16 = scalar_lea.hbm %s1706_s6, 128  ;;  %s1222_s10 = scalar_lea.hbm %s1791_s4, 256 }
 0x286   : > { %p1219_p5 = scmp.ne.s32.totalorder %s1706_s6, %s1218_s16  ;;  %p1223_p7 = scmp.lt.u32.totalorder %s1706_s6, %s1791_s4 }
 0x287   : > { %p1224_p12 = scmp.lt.u32.totalorder %s1222_s10, %s1218_s16  ;;  %p1226_p1 = scmp.lt.u32.totalorder %s1218_s16, %s1706_s6 }
 0x288   : > { %p1220_p8 = pnand %p1219_p5, %p1812_p10 }
 0x289   : > { %p1225_p13 = por %p1224_p12, %p1223_p7 }
 0x28a   : > { %p1221_p9 = pneg %p1220_p8 }
 0x28b   : > { %p1227_p11 = por %p1226_p1, %p1225_p13 }
 0x28d   : > { %p1228_p0 = pnand %p1227_p11, %p1221_p9 }
 0x28f   : > { %1231 = shalt.err (!%p1228_p0)
}
 0x290   : > { %1071 = dma.vmem_to_hbm [thread:$0]  (%p1812_p10), %s821_s8, 128, %s1706_s6, %s802_s1  }
 0x291   : > { %s1732_s29 = scalar_lea.hbm %s1792_s5, %s1011_s21  ;;  %s833_s30 = sshll.u32 %s1561_s9, 4  ;;  %s834_s30 = int_to_ptr.vmem [resolvable:$true] %s833_s30 }
 0x292   : > { %s807_s23 = scalar_lea.sflag [#allocation11], %s1544_s12  ;;  %s1232_s16 = scalar_lea.vmem %s834_s30, 128 }
 0x293   : > { %p1233_p2 = scmp.ne.s32.totalorder %s834_s30, %s1232_s16  ;;  %s1358_s11 = smov [#allocation10]  }
 0x294   : > { %s1236_s7 = sshll.u32 %s1358_s11, 4  ;;  %s1237_s7 = int_to_ptr.vmem [resolvable:$false] %s1236_s7 }
 0x295   : > { %p1234_p3 = pnand %p1233_p2, %p1812_p10  ;;  %s1238_s10 = scalar_lea.vmem %s1237_s7, 256 }
 0x296   : > { %p1239_p6 = scmp.lt.s32.totalorder %s834_s30, %s1237_s7  ;;  %p1240_p5 = scmp.lt.s32.totalorder %s1238_s10, %s1232_s16 }
 0x297   : > { %p1235_p4 = pneg %p1234_p3 }
 0x298   : > { %p1241_p8 = por %p1240_p5, %p1239_p6 }
 0x29a   : > { %p1242_p9 = pnand %p1241_p8, %p1235_p4 }
 0x29c   : > { %1245 = shalt.err (!%p1242_p9)
}
 0x29d   : > { %s1246_s24 = scalar_lea.hbm %s1732_s29, 128  ;;  %s1250_s21 = scalar_lea.hbm %s1792_s5, 256 }
 0x29e   : > { %p1247_p7 = scmp.ne.s32.totalorder %s1732_s29, %s1246_s24  ;;  %p1251_p1 = scmp.lt.u32.totalorder %s1732_s29, %s1792_s5 }
 0x29f   : > { %p1252_p11 = scmp.lt.u32.totalorder %s1250_s21, %s1246_s24  ;;  %p1254_p2 = scmp.lt.u32.totalorder %s1246_s24, %s1732_s29 }
 0x2a0   : > { %p1248_p12 = pnand %p1247_p7, %p1812_p10 }
 0x2a1   : > { %p1253_p0 = por %p1252_p11, %p1251_p1 }
 0x2a2   : > { %p1249_p13 = pneg %p1248_p12 }
 0x2a3   : > { %p1255_p3 = por %p1254_p2, %p1253_p0 }
 0x2a5   : > { %p1256_p4 = pnand %p1255_p3, %p1249_p13 }
 0x2a7   : > { %1259 = shalt.err (!%p1256_p4)
}
 0x2a8   : > { %1072 = dma.vmem_to_hbm [thread:$0]  (%p1812_p10), %s834_s30, 128, %s1732_s29, %s807_s23  }
 0x2a9 PF: > { %p1082_p6 = scmp.ge.s32.totalorder %s1350_s27, 2  ;;  %s845_s1 = sand.u32 1, %s1314_s18  }
 0x2aa   : > { %p1813_p5 = scmp.ne.s32.totalorder %s1808_s28, 0  ;;  %s846_s0 = scalar_lea.sflag [#allocation8], %s845_s1 }
 0x2ac   : > { %p1076_p8 = pnand %p1082_p6, %p1813_p5 }
 0x2ae   : > { %1305 = dma.done.wait (!%p1076_p8), %s846_s0, 128  }
 0x2af   : > { %1307 = vsyncadd (!%p1076_p8), %s846_s0, 4294967168  ;;  %s855_s13 = scalar_lea.sflag [#allocation11], %s845_s1 }
 0x2b0   : > { %1309 = dma.done.wait (!%p1076_p8), %s855_s13, 128  }
 0x2b1   : > { %1311 = vsyncadd (!%p1076_p8), %s855_s13, 4294967168  ;;  %s25_s27 = sadd.s32 1, %s1350_s27   ;;  %s1814_s17 = sld [smem:[#allocation18_spill]] }
 0x2b2   : > { %p22_p9 = scmp.ge.s32.totalorder %s25_s27, 10   ;;  %s1815_s24 = sld [smem:[#allocation15_spill]] }
 0x2b3   : > { %s1816_s14 = sld [smem:[#allocation16_spill]]  ;;  %s1817_s26 = sld [smem:[#allocation17_spill]] }
 0x2b4   : > { %s1818_s18 = smov %s1318_s19  ;;  %s1819_s19 = smov %s1322_s20 }
 0x2b5   : > { %s1820_s20 = smov %s1480_s15  ;;  %s1821_s21 = smov %s1330_s22 }
 0x2b6   : > { %s1823_s23 = smov %s1342_s25  ;;  %24 = sbr.rel (!%p22_p9) target bundleno = 13 (0xd), region = 201 }
 0x2b7   : > { %s1822_s22 = smov %s1814_s17 }
 0x2b9   : > { %s1824_s25 = smov %s1816_s14 }
 0x2bd   :  { %860 = vsyncpa [#allocation7], 1 }
 0x2be   :  { %862 = vsyncpa [#allocation7 + $0x1], 1 }
 0x2bf   :  { %863 = vsyncpa [#allocation8], 1 }
 0x2c0   :  { %865 = vsyncpa [#allocation8 + $0x1], 1 }
 0x2c1   :  { %866 = vsyncpa [#allocation11], 1 }
 0x2c2   :  { %868 = vsyncpa [#allocation11 + $0x1], 1 }

</bundles_post_ra>
